<compile_context>
chip_gen: v7x
topology: tpu7x:2x2x1
jax: 0.10.0
libtpu: 0.0.40
codegen_flags: <defaults>
</compile_context>

<pallas_src>
import functools

import jax
import jax.numpy as jnp
from jax import lax
from jax.experimental import pallas as pl
from jax.experimental.pallas import tpu as pltpu


# VMEM budgets chosen for the smallest part (v7x: 64 MiB physical, 32 MiB
# default scoped).  128 MiB parts (v5e/v6e) trivially satisfy the same budget.
_FUSED_SLAB_BUDGET_BYTES = 40 * 1024 * 1024
_FUSED_VMEM_LIMIT_BYTES = 48 * 1024 * 1024
_FALLBACK_VMEM_LIMIT_BYTES = 32 * 1024 * 1024


# --------------------------- fused (primary) kernel ------------------------- #

def _se_fused_kernel(x_ref, w1_ref, b1_ref, w2_ref, b2_ref, o_ref, *,
                     inv_hw, use_mxu):
    """Pool + fc1 + ReLU + fc2 + hardsigmoid + multiply for one sample.

    Grid: (N,).
    x_ref:  (1, C, HW)  full spatial extent of sample n (NCHW view, HW on lanes)
    w1_ref: (C, Csq)    fc1 weight, input-channel-major
    b1_ref: (1, Csq)
    w2_ref: (C, Csq)    fc2 weight (PyTorch (C, Csq, 1, 1) squeezed)
    b2_ref: (C, 1)
    o_ref:  (1, C, HW)  output block (same dtype as x)
    """
    x = x_ref[0].astype(jnp.float32)                                   # (C, HW)

    # Global average pool: lane-dim reduce (vreg combines on the VPU plus the
    # single unavoidable cross-lane XLU reduce per sample).
    pooled = jnp.sum(x, axis=-1, keepdims=True) * inv_hw               # (C, 1)

    if use_mxu:
        # Large C/Csq: run the 1x1-conv MLP on the MXU (idle slot otherwise).
        h = lax.dot_general(pooled, w1_ref[...],
                            dimension_numbers=(((0,), (0,)), ((), ())),
                            preferred_element_type=jnp.float32)        # (1, Csq)
        h = jnp.maximum(h + b1_ref[...], 0.0)
        s = lax.dot_general(w2_ref[...], h,
                            dimension_numbers=(((1,), (1,)), ((), ())),
                            preferred_element_type=jnp.float32)        # (C, 1)
        s = s + b2_ref[...]
    else:
        # Tiny MLP: broadcast-multiply + reduce on the VPU.
        h = jnp.sum(pooled * w1_ref[...], axis=0, keepdims=True) + b1_ref[...]
        h = jnp.maximum(h, 0.0)                                        # (1, Csq)
        s = jnp.sum(w2_ref[...] * h, axis=1, keepdims=True) + b2_ref[...]  # (C, 1)

    # Hardsigmoid: clip(x / 6 + 1/2, 0, 1)
    scale = jnp.clip(s * (1.0 / 6.0) + 0.5, 0.0, 1.0)                  # (C, 1)

    # Excite: per-channel scale broadcast along lanes; store in input dtype.
    o_ref[0] = (x * scale).astype(o_ref.dtype)


# ------------------------- fallback (2-pass) kernels ------------------------ #

def _se_scale_kernel(x_ref, w1_ref, b1_ref, w2_ref, b2_ref, scale_ref, acc_ref,
                     *, inv_hw):
    """Fused global average pool + SE MLP for one sample (tiled over HW)."""
    l = pl.program_id(1)

    @pl.when(l == 0)
    def _():
        acc_ref[...] = jnp.zeros_like(acc_ref)

    # Partial spatial sum for this tile (accumulate in f32).
    acc_ref[...] += jnp.sum(x_ref[0].astype(jnp.float32), axis=-1, keepdims=True)

    @pl.when(l == pl.num_programs(1) - 1)
    def _():
        pooled = acc_ref[...] * inv_hw                                  # (C, 1)
        h = jnp.sum(pooled * w1_ref[...], axis=0, keepdims=True) + b1_ref[...]
        h = jnp.maximum(h, 0.0)                                         # (1, Csq)
        s = jnp.sum(w2_ref[...] * h, axis=1, keepdims=True) + b2_ref[...]
        scale_ref[0] = jnp.clip(s * (1.0 / 6.0) + 0.5, 0.0, 1.0)        # (C, 1)


def _apply_scale_kernel(x_ref, scale_ref, o_ref):
    """Lane-dense elementwise x * scale (scale broadcasts along lanes)."""
    o_ref[...] = (x_ref[...].astype(jnp.float32) * scale_ref[...]).astype(o_ref.dtype)


# ------------------------------ tile helpers -------------------------------- #

def _pick_lane_tile(hw, rows, max_block_bytes=4 << 20):
    """Largest multiple-of-128 divisor of hw whose (rows, TL) f32 block fits."""
    if hw % 128 != 0:
        return hw                         # full-extent block is always legal
    cap = max(128, (max_block_bytes // (rows * 4)) // 128 * 128)
    t = min(hw, cap)
    while t >= 128:
        if hw % t == 0:
            return t
        t -= 128
    return hw


def _pick_row_tile(r, max_rows=512):
    """Multiple-of-8 divisor of r (or full extent) for the sublane axis."""
    if r <= max_rows:
        return r
    t = (max_rows // 8) * 8
    while t >= 8:
        if r % t == 0:
            return t
        t -= 8
    return r


# -------------------------------- wrappers ----------------------------------- #

def _prep_params(params, c):
    """Weight/bias layout prep (pure glue, no arithmetic)."""
    csq = params["w1"].shape[0]                        # conv1 weight: (Csq, C, 1, 1)
    w1t = params["w1"].reshape(csq, c).T               # (C, Csq)
    b1r = params["b1"].reshape(1, csq)
    w2s = params["w2"].reshape(c, csq)                 # (C, Csq)
    b2r = params["b2"].reshape(c, 1)
    return w1t, b1r, w2s, b2r, csq


def _fused_forward(x3, w1t, b1r, w2s, b2r, hw):
    n, c, _ = x3.shape
    csq = w1t.shape[1]
    use_mxu = (c >= 128 and csq >= 128)
    # TODO(synk): for v7x with N < 2 add a second "parallel" grid axis (e.g.
    # channel blocks with per-block partial sums) so both TensorCores are busy.
    return pl.pallas_call(
        functools.partial(_se_fused_kernel, inv_hw=1.0 / hw, use_mxu=use_mxu),
        out_shape=jax.ShapeDtypeStruct((n, c, hw), x3.dtype),
        grid_spec=pltpu.PrefetchScalarGridSpec(
            num_scalar_prefetch=0,
            grid=(n,),
            in_specs=[
                pl.BlockSpec((1, c, hw), lambda i: (i, 0, 0)),
                # Grid-invariant weights: constant index map -> no re-fetch
                # across samples.  (For very large C they could additionally be
                # single-buffered to save VMEM.)
                pl.BlockSpec((c, csq), lambda i: (0, 0)),
                pl.BlockSpec((1, csq), lambda i: (0, 0)),
                pl.BlockSpec((c, csq), lambda i: (0, 0)),
                pl.BlockSpec((c, 1), lambda i: (0, 0)),
            ],
            out_specs=pl.BlockSpec((1, c, hw), lambda i: (i, 0, 0)),
        ),
        compiler_params=pltpu.CompilerParams(
            dimension_semantics=("parallel",),
            vmem_limit_bytes=_FUSED_VMEM_LIMIT_BYTES),
    )(x3, w1t, b1r, w2s, b2r)


def _two_pass_forward(x3, w1t, b1r, w2s, b2r, hw, out_dtype):
    n, c, _ = x3.shape
    csq = w1t.shape[1]

    # ---- Pass 1: fused global-avg-pool + SE MLP -> per-(n, c) scale ----
    tl1 = _pick_lane_tile(hw, rows=c)
    grid1 = (n, hw // tl1)
    scale = pl.pallas_call(
        functools.partial(_se_scale_kernel, inv_hw=1.0 / hw),
        out_shape=jax.ShapeDtypeStruct((n, c, 1), jnp.float32),
        grid_spec=pltpu.PrefetchScalarGridSpec(
            num_scalar_prefetch=0,
            grid=grid1,
            in_specs=[
                pl.BlockSpec((1, c, tl1), lambda i, l: (i, 0, l)),
                pl.BlockSpec((c, csq), lambda i, l: (0, 0)),
                pl.BlockSpec((1, csq), lambda i, l: (0, 0)),
                pl.BlockSpec((c, csq), lambda i, l: (0, 0)),
                pl.BlockSpec((c, 1), lambda i, l: (0, 0)),
            ],
            out_specs=pl.BlockSpec((1, c, 1), lambda i, l: (i, 0, 0)),
            scratch_shapes=[pltpu.VMEM((c, 1), jnp.float32)],
        ),
        compiler_params=pltpu.CompilerParams(
            dimension_semantics=("parallel", "arbitrary"),
            vmem_limit_bytes=_FALLBACK_VMEM_LIMIT_BYTES),
    )(x3, w1t, b1r, w2s, b2r)

    # ---- Pass 2: lane-dense x * scale over the (N*C, H*W) view ----
    # TODO(synk): pad HW to a multiple of 128 (or put C on the lane axis when
    # C % 128 == 0) to avoid masked partial stores when HW % 128 != 0.
    r = n * c
    x2 = x3.reshape(r, hw)
    scale2 = scale.reshape(r, 1)
    tr = _pick_row_tile(r)
    tl2 = _pick_lane_tile(hw, rows=tr)
    grid2 = (r // tr, hw // tl2)
    out2 = pl.pallas_call(
        _apply_scale_kernel,
        out_shape=jax.ShapeDtypeStruct((r, hw), out_dtype),
        grid_spec=pltpu.PrefetchScalarGridSpec(
            num_scalar_prefetch=0,
            grid=grid2,
            in_specs=[
                pl.BlockSpec((tr, tl2), lambda i, l: (i, l)),
                pl.BlockSpec((tr, 1), lambda i, l: (i, 0)),
            ],
            out_specs=pl.BlockSpec((tr, tl2), lambda i, l: (i, l)),
        ),
        compiler_params=pltpu.CompilerParams(
            dimension_semantics=("parallel", "parallel"),
            vmem_limit_bytes=_FALLBACK_VMEM_LIMIT_BYTES),
    )(x2, scale2)
    return out2.reshape(n, c, hw)


def squeeze_excitation_forward(x_nchw, params, *, force_two_pass=False):
    """SqueezeExcitation forward: x * hardsigmoid(fc2(relu(fc1(gap(x)))))."""
    n, c, h, w = x_nchw.shape
    hw = h * w
    x3 = x_nchw.reshape(n, c, hw)                      # free view: HW on lanes
    w1t, b1r, w2s, b2r, csq = _prep_params(params, c)

    # Fused-path VMEM estimate: double-buffered per-sample x + out blocks,
    # double-buffered weights/biases, plus headroom for epilogue temporaries.
    ib = x_nchw.dtype.itemsize
    slab_bytes = (2 * c * hw * (ib + ib)
                  + 2 * (2 * c * csq + csq + c) * 4
                  + (1 << 20))

    if (not force_two_pass) and slab_bytes <= _FUSED_SLAB_BUDGET_BYTES:
        out3 = _fused_forward(x3, w1t, b1r, w2s, b2r, hw)
    else:
        out3 = _two_pass_forward(x3, w1t, b1r, w2s, b2r, hw, x_nchw.dtype)
    return out3.reshape(n, c, h, w)


# -------------------------- plain-JAX reference ----------------------------- #

def reference_forward(x_nchw, params):
    n, c, h, w = x_nchw.shape
    csq = params["w1"].shape[0]
    pooled = jnp.mean(x_nchw, axis=(2, 3))                         # (N, C)
    h1 = pooled @ params["w1"].reshape(csq, c).T + params["b1"]    # (N, Csq)
    h1 = jnp.maximum(h1, 0.0)
    s = h1 @ params["w2"].reshape(c, csq).T + params["b2"]         # (N, C)
    s = jnp.clip(s * (1.0 / 6.0) + 0.5, 0.0, 1.0)                  # hardsigmoid
    return x_nchw * s[:, :, None, None]


# ---------------------------------- main ------------------------------------ #

if __name__ == "__main__":
    N, C_IN, H, W = 2, 4, 16, 16          # x: NCHW, matches PyTorch Conv2d input
    SQUEEZE = 3
    C_SQ = max(1, C_IN // SQUEEZE)        # nn.Conv2d(C_in, C_in // 3, 1)

    key = jax.random.PRNGKey(0)
    ks = jax.random.split(key, 5)
    x = jax.random.normal(ks[0], (N, C_IN, H, W), jnp.float32)

    params = {
        # nn.Conv2d(C_in, C_sq, 1): weight OIHW + bias
        "w1": 0.5 * jax.random.normal(ks[1], (C_SQ, C_IN, 1, 1), jnp.float32),
        "b1": 0.1 * jax.random.normal(ks[2], (C_SQ,), jnp.float32),
        # nn.Conv2d(C_sq, C_in, 1): weight OIHW + bias
        "w2": 0.5 * jax.random.normal(ks[3], (C_IN, C_SQ, 1, 1), jnp.float32),
        "b2": 0.1 * jax.random.normal(ks[4], (C_IN,), jnp.float32),
    }

    ref = jax.block_until_ready(reference_forward(x, params))

    # Primary (fused, single-pass) path.
    out = jax.block_until_ready(squeeze_excitation_forward(x, params))
    assert out.shape == (N, C_IN, H, W), out.shape
    err_fused = float(jnp.max(jnp.abs(out - ref)))
    assert jnp.allclose(out, ref, atol=1e-5, rtol=1e-5), err_fused

    # Fallback (2-pass) path, exercised explicitly for coverage.
    out2p = jax.block_until_ready(
        squeeze_excitation_forward(x, params, force_two_pass=True))
    err_2p = float(jnp.max(jnp.abs(out2p - ref)))
    assert jnp.allclose(out2p, ref, atol=1e-5, rtol=1e-5), err_2p

    print("KERNEL_OK")
</pallas_src>

<mosaic_0001>
module attributes {stable_mosaic.version = 11 : i64} {
  func.func @_se_fused_kernel(%arg0: i32, %arg1: memref<1x4x256xf32, #tpu.memory_space<vmem>>, %arg2: memref<4x1xf32, #tpu.memory_space<vmem>>, %arg3: memref<1x1xf32, #tpu.memory_space<vmem>>, %arg4: memref<4x1xf32, #tpu.memory_space<vmem>>, %arg5: memref<4x1xf32, #tpu.memory_space<vmem>>, %arg6: memref<1x4x256xf32, #tpu.memory_space<vmem>>) attributes {dimension_semantics = [#tpu.dimension_semantics<parallel>], iteration_bounds = array<i64: 2>, scalar_prefetch = 0 : i64, scratch_operands = 0 : i64, tpu.core_type = #tpu.core_type<tc>, window_params = [{transform_indices = @transform_0, window_bounds = array<i64: 1, 4, 256>}, {pipeline_mode = #tpu.pipeline_mode<synchronous>, transform_indices = @transform_1, window_bounds = array<i64: 4, 1>}, {pipeline_mode = #tpu.pipeline_mode<synchronous>, transform_indices = @transform_2, window_bounds = array<i64: 1, 1>}, {pipeline_mode = #tpu.pipeline_mode<synchronous>, transform_indices = @transform_3, window_bounds = array<i64: 4, 1>}, {pipeline_mode = #tpu.pipeline_mode<synchronous>, transform_indices = @transform_4, window_bounds = array<i64: 4, 1>}, {transform_indices = @transform_5, window_bounds = array<i64: 1, 4, 256>}]} {
    %c0 = arith.constant 0 : index
    %c0_0 = arith.constant 0 : index
    %c0_1 = arith.constant 0 : index
    %0 = vector.load %arg1[%c0, %c0_0, %c0_1] : memref<1x4x256xf32, #tpu.memory_space<vmem>>, vector<1x4x256xf32>
    %1 = vector.shape_cast %0 : vector<1x4x256xf32> to vector<4x256xf32>
    %cst = arith.constant dense<0.000000e+00> : vector<4xf32>
    %2 = vector.multi_reduction <add>, %1, %cst [1] : vector<4x256xf32> to vector<4xf32>
    %3 = vector.shape_cast %2 : vector<4xf32> to vector<4x1xf32>
    %cst_2 = arith.constant 3.906250e-03 : f32
    %4 = vector.broadcast %cst_2 : f32 to vector<4x1xf32>
    %5 = arith.mulf %3, %4 : vector<4x1xf32>
    %c0_3 = arith.constant 0 : index
    %c0_4 = arith.constant 0 : index
    %6 = vector.load %arg2[%c0_3, %c0_4] : memref<4x1xf32, #tpu.memory_space<vmem>>, vector<4x1xf32>
    %7 = arith.mulf %5, %6 : vector<4x1xf32>
    %cst_5 = arith.constant dense<0.000000e+00> : vector<1xf32>
    %8 = vector.multi_reduction <add>, %7, %cst_5 [0] : vector<4x1xf32> to vector<1xf32>
    %9 = vector.shape_cast %8 : vector<1xf32> to vector<1x1xf32>
    %c0_6 = arith.constant 0 : index
    %c0_7 = arith.constant 0 : index
    %10 = vector.load %arg3[%c0_6, %c0_7] : memref<1x1xf32, #tpu.memory_space<vmem>>, vector<1x1xf32>
    %11 = arith.addf %9, %10 : vector<1x1xf32>
    %cst_8 = arith.constant 0.000000e+00 : f32
    %12 = vector.broadcast %cst_8 : f32 to vector<1x1xf32>
    %13 = arith.maximumf %11, %12 : vector<1x1xf32>
    %c0_9 = arith.constant 0 : index
    %c0_10 = arith.constant 0 : index
    %14 = vector.load %arg4[%c0_9, %c0_10] : memref<4x1xf32, #tpu.memory_space<vmem>>, vector<4x1xf32>
    %15 = vector.broadcast %13 : vector<1x1xf32> to vector<4x1xf32>
    %16 = arith.mulf %14, %15 : vector<4x1xf32>
    %cst_11 = arith.constant dense<0.000000e+00> : vector<4xf32>
    %17 = vector.multi_reduction <add>, %16, %cst_11 [1] : vector<4x1xf32> to vector<4xf32>
    %18 = vector.shape_cast %17 : vector<4xf32> to vector<4x1xf32>
    %c0_12 = arith.constant 0 : index
    %c0_13 = arith.constant 0 : index
    %19 = vector.load %arg5[%c0_12, %c0_13] : memref<4x1xf32, #tpu.memory_space<vmem>>, vector<4x1xf32>
    %20 = arith.addf %18, %19 : vector<4x1xf32>
    %cst_14 = arith.constant 0.166666672 : f32
    %21 = vector.broadcast %cst_14 : f32 to vector<4x1xf32>
    %22 = arith.mulf %20, %21 : vector<4x1xf32>
    %cst_15 = arith.constant 5.000000e-01 : f32
    %23 = vector.broadcast %cst_15 : f32 to vector<4x1xf32>
    %24 = arith.addf %22, %23 : vector<4x1xf32>
    %cst_16 = arith.constant 0.000000e+00 : f32
    %cst_17 = arith.constant 1.000000e+00 : f32
    %25 = vector.broadcast %cst_16 : f32 to vector<4x1xf32>
    %26 = arith.maximumf %25, %24 : vector<4x1xf32>
    %27 = vector.broadcast %cst_17 : f32 to vector<4x1xf32>
    %28 = arith.minimumf %27, %26 : vector<4x1xf32>
    %29 = vector.broadcast %28 : vector<4x1xf32> to vector<4x256xf32>
    %30 = arith.mulf %1, %29 : vector<4x256xf32>
    %c0_18 = arith.constant 0 : index
    %c0_19 = arith.constant 0 : index
    %c0_20 = arith.constant 0 : index
    %31 = vector.load %arg6[%c0_18, %c0_19, %c0_20] : memref<1x4x256xf32, #tpu.memory_space<vmem>>, vector<1x4x256xf32>
    %32 = vector.shape_cast %31 : vector<1x4x256xf32> to vector<4x256xf32>
    %33 = vector.shape_cast %30 : vector<4x256xf32> to vector<1x4x256xf32>
    tpu.vector_store %arg6[%c0_18, %c0_19, %c0_20], %33 {strides = array<i32>} : memref<1x4x256xf32, #tpu.memory_space<vmem>>, vector<1x4x256xf32>,
    return
  }
  func.func @transform_0(%arg0: i32) -> (i32, i32, i32) {
    %c0_i32 = arith.constant 0 : i32
    %c0_i32_0 = arith.constant 0 : i32
    %c0_i32_1 = arith.constant 0 : i32
    return %arg0, %c0_i32, %c0_i32_0 : i32, i32, i32
  }
  func.func @transform_1(%arg0: i32) -> (i32, i32) {
    %c0_i32 = arith.constant 0 : i32
    %c0_i32_0 = arith.constant 0 : i32
    %c0_i32_1 = arith.constant 0 : i32
    return %c0_i32, %c0_i32_0 : i32, i32
  }
  func.func @transform_2(%arg0: i32) -> (i32, i32) {
    %c0_i32 = arith.constant 0 : i32
    %c0_i32_0 = arith.constant 0 : i32
    %c0_i32_1 = arith.constant 0 : i32
    return %c0_i32, %c0_i32_0 : i32, i32
  }
  func.func @transform_3(%arg0: i32) -> (i32, i32) {
    %c0_i32 = arith.constant 0 : i32
    %c0_i32_0 = arith.constant 0 : i32
    %c0_i32_1 = arith.constant 0 : i32
    return %c0_i32, %c0_i32_0 : i32, i32
  }
  func.func @transform_4(%arg0: i32) -> (i32, i32) {
    %c0_i32 = arith.constant 0 : i32
    %c0_i32_0 = arith.constant 0 : i32
    %c0_i32_1 = arith.constant 0 : i32
    return %c0_i32, %c0_i32_0 : i32, i32
  }
  func.func @transform_5(%arg0: i32) -> (i32, i32, i32) {
    %c0_i32 = arith.constant 0 : i32
    %c0_i32_0 = arith.constant 0 : i32
    %c0_i32_1 = arith.constant 0 : i32
    return %arg0, %c0_i32, %c0_i32_0 : i32, i32, i32
  }
}

</mosaic_0001>

<bundles_post_ra>
// kernel: tpu_custom_call.1
= control target key start
LH: loop header
LB: loop body
LE: loop exit
PB: predicated region body
PF: predicated region fallthrough
CT: control target
= control target key end

     0   :  { %s616_s0 = inlined_call_operand.vmem [shape: f32[2,4,256], index: 0, kind: input, shape index: {}]   ;;  %s617_s1 = inlined_call_operand.vmem [shape: f32[4,1], index: 1, kind: input, shape index: {}]   ;;  %s618_s2 = inlined_call_operand.<no memory space> [shape: f32[1,1], index: 2, kind: input, shape index: {}]   ;;  %s619_s3 = inlined_call_operand.vmem [shape: f32[4,1], index: 3, kind: input, shape index: {}]   ;;  %s620_s4 = inlined_call_operand.vmem [shape: f32[4,1], index: 4, kind: input, shape index: {}]   ;;  %s621_s5 = inlined_call_operand.hbm [shape: f32[2,4,256], index: 5, kind: output, shape index: {}]  }
   0x1   :  { %v10_v0 = vstv %s618_s2 }
   0x2   :  { %11 = vst [vmem:[#allocation2] sm:$0x1] %v10_v0 }
   0x3   :  { %12 = vsyncpa [#allocation4], 0 }
   0x4   :  { %14 = vsyncpa [#allocation4 + $0x1], 0  ;;  %s507_s20 = smov 0   ;;  %s509_s21 = smov 0  }
   0x5   :  { %s511_s22 = smov 0   ;;  %s513_s23 = smov 0  }
   0x6 LB: > { %s528_s2 = sadd.s32 4294967295, %s469_s23   ;;  %s350_s24 = sadd.s32 4294967294, %s469_s23   ;;  %s469_s23 = sphi %s513_s23, %s627_s23   ;;  %s465_s22 = sphi %s511_s22, %s626_s22   ;;  %s461_s21 = sphi %s509_s21, %s625_s21   ;;  %s457_s20 = sphi %s507_s20, %s624_s20  }
   0x7   : > { %s532_s25 = sadd.s32 1, %s469_s23   ;;  %s137_s26 = sadd.s32 1, %s465_s22 }
   0x8   : > { %s134_s27 = ssub.s32 %s469_s23, %s532_s25  ;;  %p147_p0 = scmp.ne.s32.totalorder %s465_s22, %s461_s21 }
   0x9   : > { %p135_p1 = scmp.eq.s32.totalorder %s134_s27, 0  ;;  %p148_p2 = scmp.eq.s32.totalorder %s528_s2, 1 }
   0xa   : > { %p153_p3 = scmp.ne.s32.totalorder %s461_s21, %s457_s20  ;;  %p154_p4 = scmp.eq.s32.totalorder %s350_s24, 1 }
   0xb   : > { %s543_s28 = scalar_select %p135_p1, %s465_s22, %s137_s26  }
   0xc   : > { %p545_p5 = por %p148_p2, %p147_p0  ;;  %p549_p6 = por %p154_p4, %p153_p3 }
   0xd   : > { %p353_p7 = scmp.ge.s32.totalorder %s469_s23, 1  ;;  %p192_p8 = scmp.lt.s32.totalorder %s469_s23, 3 }
   0xf   : > { %p193_p9 = pnand %p353_p7, %p192_p8 }
  0x10   : > { %p220_p10 = scmp.lt.s32.totalorder (!%p193_p9), %s528_s2, 1  ;;  %vm229_vm0 = vcmask (!%p193_p9), 1043456   ;;  %v471_v6 = vmov (!%p193_p9), 0   ;;  %v236_v7 = vld [vmem:[%s617_s1] sm:$0xf] (!%p193_p9)  ;;  %vm238_vm1 = vcmask (!%p193_p9), 3072   ;;  %v250_v15 = vlaneseq (!%p193_p9) }
  0x11   : > { %196 = sbr.rel (%p193_p9) target bundleno = 357 (0x165), region = 40  ;;  %405 = vset.pattern.permute.xlu0 (!%p193_p9), %v471_v6  ;;  %v246_v19 = vld [vmem:[#allocation2] sm:$0x1] (!%p193_p9)  ;;  %v472_v33 = vmov (!%p193_p9), 839922192   ;;  %s217_s17 = sand.u32 (!%p193_p9), 1, %s461_s21  }
  0x12   : > { %v251_v18 = vshrl.u32 (!%p193_p9), %v250_v15, 7  ;;  %v249_v24 = vld [vmem:[%s619_s3] sm:$0xf] (!%p193_p9)  ;;  %v267_v34 = vunpack.c.l.s4 (!%p193_p9), %v472_v33  ;;  %s354_s18 = sshll.u32 (!%p193_p9), %s217_s17, 3  ;;  %s363_s19 = sshll.u32 (!%p193_p9), %s528_s2, 7 }
  0x13   : > { %v256_v26 = vld [vmem:[%s620_s4] sm:$0xf] (!%p193_p9)  ;;  %s219_s24 = scalar_lea.vmem (!%p193_p9), [#allocation3], %s354_s18  ;;  %s277_s8 = scalar_lea.sflag (!%p193_p9), [#allocation4], %s217_s17 }
  0x14   : > { %v252_v22 = vsub.s32 (!%p193_p9), 0, %v251_v18  ;;  %v268_v35 = vunpack.c.0.s8 (!%p193_p9), %v267_v34  ;;  %s291_s26 = sshll.u32 (!%p193_p9), %s219_s24, 4  ;;  %s576_s26 = int_to_ptr.vmem [resolvable:$true] %s291_s26 }
  0x15   : > { %s407_s9 = scalar_lea.vmem (!%p193_p9), %s576_s26, 128 }
  0x16   : > { %v271_v36 = vsub.s32 (!%p193_p9), %v268_v35, %v251_v18  ;;  %p408_p11 = scmp.ne.s32.totalorder (!%p193_p9), %s576_s26, %s407_s9 }
  0x18   : > { %s221_s6 = scalar_select %p220_p10, %s528_s2, 1 }
  0x19   : > { %p409_p12 = pnand %p408_p11, %p545_p5  ;;  %s473_s2 = smov [#allocation3]  }
  0x1a   : > { %s362_s7 = sshll.u32 %s221_s6, 3 }
  0x1b   : > { %s224_s10 = scalar_lea.vmem %s616_s0, %s362_s7  ;;  %s574_s7 = scalar_lea.hbm %s621_s5, %s363_s19 }
  0x1c   : > { %v225_v1 = vld [vmem:[%s224_s10] sm:$0xff]  ;;  %p410_p13 = pneg %p409_p12  ;;  %s411_s10 = sshll.u32 %s473_s2, 4  ;;  %s412_s10 = int_to_ptr.vmem [resolvable:$false] %s411_s10 }
  0x1d   : > { %v227_v2 = vcombine.high %v225_v1, %v225_v1  ;;  %v230_v3 = vsel %vm229_vm0, %v225_v1, 0.0  ;;  %s413_s11 = scalar_lea.vmem %s412_s10, 256  ;;  %p414_p0 = scmp.lt.s32.totalorder %s576_s26, %s412_s10 }
  0x1e   : > { %p415_p1 = scmp.lt.s32.totalorder %s413_s11, %s407_s9 }
  0x1f   : > { %v231_v4 = vsel %vm229_vm0, %v227_v2, 0.0 }
  0x20   : > { %v232_v5 = vadd.f32 %v231_v4, %v230_v3  ;;  %p416_p2 = por %p415_p1, %p414_p0 }
  0x22   : > { %233 = vadd.xlane.f32.xlu0 %v232_v5  ;;  %p417_p3 = pnand %p416_p2, %p410_p13 }
  0xaf   : > { %v234_v8 = vpop.xlane.xlu0 %233 }
  0xb0   : > { %v235_v9 = vmul.f32 0.00390625, %v234_v8 }
  0xb2   : > { %v237_v10 = vmul.f32 %v236_v7, %v235_v9 }
  0xb4   : > { %v239_v11 = vsel %vm238_vm1, %v237_v10, 0.0 }
  0xb5   : > { %v240_v12 = vrot.slane %v239_v11, 4 }
  0xb7   : > { %v241_v13 = vadd.f32 %v240_v12, %v239_v11 }
  0xb9   : > { %v242_v14 = vrot.slane %v241_v13, 2 }
  0xbb   : > { %v243_v16 = vadd.f32 %v242_v14, %v241_v13 }
  0xbd   : > { %v244_v17 = vrot.slane %v243_v16, 1 }
  0xbf   : > { %v245_v20 = vadd.f32 %v244_v17, %v243_v16 }
  0xc1   : > { %v247_v21 = vadd.f32 %v246_v19, %v245_v20 }
  0xc3   : > { %v248_v23 = vmax.f32 %v247_v21, 0.0 }
  0xc5   : > { %v253_v25 = vrot.slane %v248_v23, %v252_v22 }
  0xc7   : > { %v254_v27 = vmul.f32 %v253_v25, %v249_v24 }
  0xc9   : > { %v257_v28 = vadd.f32 %v256_v26, %v254_v27 }
  0xcb   : > { %v258_v29 = vmul.f32 0.16666667, %v257_v28 }
  0xcd   : > { %v259_v30 = vadd.f32 0.5, %v258_v29 }
  0xcf   : > { %v260_v31 = vmax.f32 %v259_v30, 0.0 }
  0xd1   : > { %v261_v32 = vmin.f32 %v260_v31, 1.0 }
  0xd3   : > { %264 = vperm.xlu0 %405, %v261_v32  }
 0x152   : > { %v265_v37 = vpop.permute.xlu0 %264 }
 0x153   : > { %v272_v38 = vrot.slane %v265_v37, %v271_v36 }
 0x155   : > { %v274_v39 = vmul.f32 %v272_v38, %v225_v1 }
 0x157   : > { %275 = vst [vmem:[%s219_s24] sm:$0xff] %v274_v39 }
 0x158   : > { %420 = shalt.err (!%p417_p3)
}
 0x159   : > { %s421_s12 = scalar_lea.hbm %s574_s7, 128  ;;  %s425_s15 = scalar_lea.hbm %s621_s5, 256 }
 0x15a   : > { %p422_p4 = scmp.ne.s32.totalorder %s574_s7, %s421_s12  ;;  %p426_p9 = scmp.lt.u32.totalorder %s574_s7, %s621_s5 }
 0x15b   : > { %p427_p10 = scmp.lt.u32.totalorder %s425_s15, %s421_s12  ;;  %p429_p12 = scmp.lt.u32.totalorder %s421_s12, %s574_s7 }
 0x15c   : > { %p423_p7 = pnand %p422_p4, %p545_p5 }
 0x15d   : > { %p428_p11 = por %p427_p10, %p426_p9 }
 0x15e   : > { %p424_p8 = pneg %p423_p7 }
 0x15f   : > { %p430_p13 = por %p429_p12, %p428_p11 }
 0x161   : > { %p431_p0 = pnand %p430_p13, %p424_p8 }
 0x163   : > { %434 = shalt.err (!%p431_p0)
}
 0x164   : > { %364 = dma.vmem_to_hbm [thread:$0]  (%p545_p5), %s576_s26, 128, %s574_s7, %s277_s8  }
 0x165 PF: > { %p370_p1 = scmp.ge.s32.totalorder %s469_s23, 2  ;;  %s303_s18 = sand.u32 1, %s457_s20  }
 0x166   : > { %s304_s19 = scalar_lea.sflag [#allocation4], %s303_s18 }
 0x167   : > { %p367_p2 = pnand %p370_p1, %p549_p6 }
 0x169   : > { %452 = dma.done.wait (!%p367_p2), %s304_s19, 128  }
 0x16a   : > { %454 = vsyncadd (!%p367_p2), %s304_s19, 4294967168  ;;  %p17_p3 = scmp.ge.s32.totalorder %s532_s25, 4   ;;  %s624_s20 = smov %s461_s21 }
 0x16b   : > { %s625_s21 = smov %s465_s22  ;;  %s626_s22 = smov %s543_s28 }
 0x16c   : > { %s627_s23 = smov %s532_s25  ;;  %19 = sbr.rel (!%p17_p3) target bundleno = 6 (0x6), region = 75 }
 0x173   :  { %309 = vsyncpa [#allocation4], 1 }
 0x174   :  { %311 = vsyncpa [#allocation4 + $0x1], 1 }

</bundles_post_ra>
